<compile_context>
chip_gen: v5e
topology: v5e:2x2
jax: 0.10.0
libtpu: 0.0.40
codegen_flags: <defaults>
</compile_context>

<pallas_src>
import math

import jax
import jax.numpy as jnp
from jax.experimental import pallas as pl
from jax.experimental.pallas import tpu as pltpu


def attention_head_kernel(x_ref, mask_ref, wqkv_ref, bqkv_ref, o_ref):
    """Fused QKV projection + scaled-dot-product attention for `bt` batch rows.

    Block shapes:
      x      (bt, S, E)
      mask   (bt or 1, S, S)  int; 0 = masked (broadcasts over bt if shared)
      W_qkv  (E, 3*Hp)        softmax scale folded into the Q slice; zero-padded lanes
      b_qkv  (1, 3*Hp)        float32
      out    (bt, S, Hp)
    """
    bt, s, e = x_ref.shape
    hp = wqkv_ref.shape[-1] // 3
    mm_dtype = wqkv_ref.dtype            # f32 by default; bf16 when mxu_dtype is set

    x = x_ref[...]
    mask = mask_ref[...]
    w_qkv = wqkv_ref[...]
    b_qkv = bqkv_ref[...]

    # One MXU pass for Q, K and V: N = 3*Hp is lane-dense and the LHS is pushed once.
    x2 = x.astype(mm_dtype).reshape(bt * s, e)
    qkv = jnp.dot(x2, w_qkv, preferred_element_type=jnp.float32)
    qkv = qkv.reshape(bt, s, 3 * hp) + b_qkv          # bias add in f32

    q = qkv[:, :, 0:hp]            # already scaled by 1/sqrt(n_embed) via W_qkv/b_qkv
    k = qkv[:, :, hp:2 * hp]
    v = qkv[:, :, 2 * hp:3 * hp]

    # Attention logits: contract last dims of q and k directly (no k.T / XLU transpose).
    logits = jnp.einsum("bqh,bkh->bqk", q.astype(mm_dtype), k.astype(mm_dtype),
                        preferred_element_type=jnp.float32)          # (bt, S, S)

    # masked_fill(mask == 0, -1e9); a shared (1, S, S) mask broadcasts over bt.
    logits = jnp.where(mask == 0, jnp.float32(-1000000000.0), logits)

    # Numerically stable softmax; normalization deferred past the P@V matmul so the
    # divide touches S*Hp elements instead of S*S.
    m = jnp.max(logits, axis=-1, keepdims=True)
    p = jnp.exp(logits - m)
    denom = jnp.sum(p, axis=-1, keepdims=True)

    # TODO(synk): dropout on the attention scores omitted (eval-mode forward => identity).

    ctx = jnp.einsum("bqk,bkh->bqh", p.astype(mm_dtype), v.astype(mm_dtype),
                     preferred_element_type=jnp.float32)             # (bt, S, Hp)
    # pl.reciprocal(..., approx=True) would move this to the otherwise-idle EUP slot;
    # exact is kept so the f32 path matches the reference to 1e-5.
    ctx = ctx * pl.reciprocal(denom, approx=False)

    o_ref[...] = ctx.astype(o_ref.dtype)


def bert_attention_head(x, mask, wq, bq, wk, bk, wv, bv, *,
                        block_b=None, mxu_dtype=None):
    """x: (B, S, E); mask: (S,S) | (1,S,S) | (B,S,S); weights (E, H); biases (H,).

    mxu_dtype=jnp.bfloat16 casts MXU operands (x, W_qkv, q, k, p, v) to bf16 with f32
    accumulation (recommended on v6e/v7x); softmax math and bias adds stay in f32.
    """
    B, S, E = x.shape
    H = wq.shape[-1]
    out_dtype = x.dtype

    # Lane-dense head dim: pad H up to a multiple of 128. Zero columns are inert: they
    # contribute 0 to q.k and produce 0 context columns, sliced off below.
    Hp = ((H + 127) // 128) * 128

    scale = 1.0 / math.sqrt(float(E))   # NB: module scales by sqrt(n_embed), not sqrt(H)

    def pad_w(w):
        return jnp.pad(w, ((0, 0), (0, Hp - H)))

    def pad_b(b):
        return jnp.pad(b, (0, Hp - H)).reshape(1, Hp)

    # Fuse QKV into one weight/bias; fold the softmax scale into the Q projection.
    w_qkv = jnp.concatenate([pad_w(wq * scale), pad_w(wk), pad_w(wv)], axis=1)
    b_qkv = jnp.concatenate([pad_b(bq * scale), pad_b(bk), pad_b(bv)], axis=1)
    b_qkv = b_qkv.astype(jnp.float32)

    if mxu_dtype is not None:
        x = x.astype(mxu_dtype)
        w_qkv = w_qkv.astype(mxu_dtype)

    if mask.ndim == 2:
        mask = mask[None]
    shared_mask = mask.shape[0] == 1

    if block_b is None:
        # Amortize the ~0.35us per-grid-step pipeline overhead over several batch rows
        # when the per-row working set is tiny; keep the block footprint modest.
        bytes_per_row = 4 * (S * E + 2 * S * S + 4 * S * Hp)
        block_b = 1
        for cand in range(2, min(B, 8) + 1):
            if B % cand == 0 and cand * bytes_per_row <= (4 << 20):
                block_b = cand
    assert B % block_b == 0

    grid = (B // block_b,)
    per_batch = lambda b: (b, 0, 0)
    whole2d = lambda b: (0, 0)

    if shared_mask:
        # One (S, S) mask tile stays resident in VMEM across all grid steps.
        mask_spec = pl.BlockSpec((1, S, S), lambda b: (0, 0, 0))
    else:
        mask_spec = pl.BlockSpec((block_b, S, S), per_batch)

    out = pl.pallas_call(
        attention_head_kernel,
        out_shape=jax.ShapeDtypeStruct((B, S, Hp), out_dtype),
        grid_spec=pltpu.PrefetchScalarGridSpec(
            num_scalar_prefetch=0,
            grid=grid,
            in_specs=[
                pl.BlockSpec((block_b, S, E), per_batch),   # x
                mask_spec,                                  # mask
                pl.BlockSpec((E, 3 * Hp), whole2d),         # fused W_qkv (resident)
                pl.BlockSpec((1, 3 * Hp), whole2d),         # fused b_qkv (resident)
            ],
            out_specs=pl.BlockSpec((block_b, S, Hp), per_batch),
        ),
        compiler_params=pltpu.CompilerParams(
            dimension_semantics=("parallel",),
            # Headroom for larger S; harmless at the tiny test shapes.
            vmem_limit_bytes=64 * 1024 * 1024,
        ),
    )(x, mask, w_qkv, b_qkv)

    # Drop the lane padding back to the true head size.
    return out[..., :H]


def reference_attention_head(x, mask, wq, bq, wk, bk, wv, bv):
    """Pure-JAX reference matching the PyTorch forward (dropout = identity)."""
    q = x @ wq + bq
    k = x @ wk + bk
    v = x @ wv + bv
    n_embed = x.shape[-1]
    w = jnp.einsum("bsh,bth->bst", q, k) / math.sqrt(n_embed)
    w = jnp.where(mask == 0, -1000000000.0, w)
    scores = jax.nn.softmax(w, axis=-1)
    return jnp.einsum("bst,bth->bsh", scores, v)


if __name__ == "__main__":
    # Small shapes consistent with the module: B=2, seq=8, n_embed=32, head_size=16.
    B, S, E, H = 2, 8, 32, 16

    key = jax.random.PRNGKey(0)
    kx, kwq, kbq, kwk, kbk, kwv, kbv = jax.random.split(key, 7)

    x = jax.random.normal(kx, (B, S, E), dtype=jnp.float32)

    bound = 1.0 / math.sqrt(E)
    wq = jax.random.uniform(kwq, (E, H), jnp.float32, -bound, bound)
    bq = jax.random.uniform(kbq, (H,), jnp.float32, -bound, bound)
    wk = jax.random.uniform(kwk, (E, H), jnp.float32, -bound, bound)
    bk = jax.random.uniform(kbk, (H,), jnp.float32, -bound, bound)
    wv = jax.random.uniform(kwv, (E, H), jnp.float32, -bound, bound)
    bv = jax.random.uniform(kbv, (H,), jnp.float32, -bound, bound)

    # Causal mask shared across the batch: 1 = attend, 0 = masked.
    mask = jnp.tril(jnp.ones((S, S), dtype=jnp.int32))[None]   # (1, S, S)

    ref = reference_attention_head(x, mask, wq, bq, wk, bk, wv, bv)

    # Default f32 path: exact-math parity with the reference.
    out = bert_attention_head(x, mask, wq, bq, wk, bk, wv, bv)
    out = jax.block_until_ready(out)
    assert out.shape == (B, S, H)
    assert jnp.allclose(out, ref, atol=1e-5, rtol=1e-5), "f32 kernel mismatch vs reference"

    # bf16-operand / f32-accumulate MXU path (v6e/v7x recipe): looser tolerance.
    out_bf16 = bert_attention_head(x, mask, wq, bq, wk, bk, wv, bv,
                                   mxu_dtype=jnp.bfloat16)
    out_bf16 = jax.block_until_ready(out_bf16)
    assert jnp.allclose(out_bf16, ref, atol=5e-2, rtol=5e-2), "bf16 kernel mismatch vs reference"

    print("KERNEL_OK")
</pallas_src>

<mosaic_0001>
module attributes {stable_mosaic.version = 11 : i64} {
  func.func @attention_head_kernel(%arg0: i32, %arg1: memref<2x8x32xf32, #tpu.memory_space<vmem>>, %arg2: memref<1x8x8xi32, #tpu.memory_space<vmem>>, %arg3: memref<32x384xf32, #tpu.memory_space<vmem>>, %arg4: memref<1x384xf32, #tpu.memory_space<vmem>>, %arg5: memref<2x8x128xf32, #tpu.memory_space<vmem>>) attributes {dimension_semantics = [#tpu.dimension_semantics<parallel>], iteration_bounds = array<i64: 1>, scalar_prefetch = 0 : i64, scratch_operands = 0 : i64, tpu.core_type = #tpu.core_type<tc>, window_params = [{transform_indices = @transform_0, window_bounds = array<i64: 2, 8, 32>}, {pipeline_mode = #tpu.pipeline_mode<synchronous>, transform_indices = @transform_1, window_bounds = array<i64: 1, 8, 8>}, {pipeline_mode = #tpu.pipeline_mode<synchronous>, transform_indices = @transform_2, window_bounds = array<i64: 32, 384>}, {pipeline_mode = #tpu.pipeline_mode<synchronous>, transform_indices = @transform_3, window_bounds = array<i64: 1, 384>}, {transform_indices = @transform_4, window_bounds = array<i64: 2, 8, 128>}]} {
    %c0 = arith.constant 0 : index
    %c0_0 = arith.constant 0 : index
    %c0_1 = arith.constant 0 : index
    %0 = vector.load %arg1[%c0, %c0_0, %c0_1] : memref<2x8x32xf32, #tpu.memory_space<vmem>>, vector<2x8x32xf32>
    %c0_2 = arith.constant 0 : index
    %c0_3 = arith.constant 0 : index
    %c0_4 = arith.constant 0 : index
    %1 = vector.load %arg2[%c0_2, %c0_3, %c0_4] : memref<1x8x8xi32, #tpu.memory_space<vmem>>, vector<1x8x8xi32>
    %c0_5 = arith.constant 0 : index
    %c0_6 = arith.constant 0 : index
    %2 = vector.load %arg3[%c0_5, %c0_6] : memref<32x384xf32, #tpu.memory_space<vmem>>, vector<32x384xf32>
    %c0_7 = arith.constant 0 : index
    %c0_8 = arith.constant 0 : index
    %3 = vector.load %arg4[%c0_7, %c0_8] : memref<1x384xf32, #tpu.memory_space<vmem>>, vector<1x384xf32>
    %4 = vector.shape_cast %0 : vector<2x8x32xf32> to vector<16x32xf32>
    %cst = arith.constant dense<0.000000e+00> : vector<16x384xf32>
    %5 = tpu.matmul %4, %2, %cst {dimension_numbers = #tpu.dot_dimension_numbers<[1], [0], [0], [1], [0, 0, 1, 1], [], []>} : vector<16x32xf32>, vector<32x384xf32>, vector<16x384xf32> -> vector<16x384xf32>
    %6 = vector.shape_cast %5 : vector<16x384xf32> to vector<2x8x384xf32>
    %7 = vector.shape_cast %3 : vector<1x384xf32> to vector<1x1x384xf32>
    %8 = vector.broadcast %7 : vector<1x1x384xf32> to vector<2x8x384xf32>
    %9 = arith.addf %6, %8 : vector<2x8x384xf32>
    %10 = vector.extract_strided_slice %9 {offsets = [0, 0, 0], sizes = [2, 8, 128], strides = [1, 1, 1]} : vector<2x8x384xf32> to vector<2x8x128xf32>
    %11 = vector.extract_strided_slice %9 {offsets = [0, 0, 128], sizes = [2, 8, 128], strides = [1, 1, 1]} : vector<2x8x384xf32> to vector<2x8x128xf32>
    %12 = vector.extract_strided_slice %9 {offsets = [0, 0, 256], sizes = [2, 8, 128], strides = [1, 1, 1]} : vector<2x8x384xf32> to vector<2x8x128xf32>
    "tpu.trace_start"() <{level = 10 : i32, message = "bqh,bkh->bqk"}> : () -> ()
    %cst_9 = arith.constant dense<0.000000e+00> : vector<2x8x8xf32>
    %13 = tpu.matmul %10, %11, %cst_9 {dimension_numbers = #tpu.dot_dimension_numbers<[2], [2], [1], [1], [0, 0, 0, 1, 1, 1], [0], [0]>} : vector<2x8x128xf32>, vector<2x8x128xf32>, vector<2x8x8xf32> -> vector<2x8x8xf32>
    %c0_i32 = arith.constant 0 : i32
    "tpu.trace_stop"() : () -> ()
    %14 = vector.broadcast %c0_i32 : i32 to vector<1x8x8xi32>
    %15 = arith.cmpi eq, %1, %14 : vector<1x8x8xi32>
    %cst_10 = arith.constant -1.000000e+09 : f32
    %16 = vector.shape_cast %15 : vector<1x8x8xi1> to vector<1x8x8xi1>
    %17 = vector.broadcast %16 : vector<1x8x8xi1> to vector<2x8x8xi1>
    %18 = vector.broadcast %cst_10 : f32 to vector<2x8x8xf32>
    %19 = arith.select %17, %18, %13 : vector<2x8x8xi1>, vector<2x8x8xf32>
    %cst_11 = arith.constant dense<0xFF800000> : vector<2x8xf32>
    %20 = vector.multi_reduction <maximumf>, %19, %cst_11 [2] : vector<2x8x8xf32> to vector<2x8xf32>
    %21 = vector.shape_cast %20 : vector<2x8xf32> to vector<2x8x1xf32>
    %22 = vector.broadcast %21 : vector<2x8x1xf32> to vector<2x8x8xf32>
    %23 = arith.subf %19, %22 : vector<2x8x8xf32>
    %24 = math.exp %23 : vector<2x8x8xf32>
    %cst_12 = arith.constant dense<0.000000e+00> : vector<2x8xf32>
    %25 = vector.multi_reduction <add>, %24, %cst_12 [2] : vector<2x8x8xf32> to vector<2x8xf32>
    %26 = vector.shape_cast %25 : vector<2x8xf32> to vector<2x8x1xf32>
    "tpu.trace_start"() <{level = 10 : i32, message = "bqk,bkh->bqh"}> : () -> ()
    %cst_13 = arith.constant dense<0.000000e+00> : vector<2x8x128xf32>
    %27 = tpu.matmul %24, %12, %cst_13 {dimension_numbers = #tpu.dot_dimension_numbers<[2], [1], [1], [2], [0, 0, 0, 1, 1, 2], [0], [0]>} : vector<2x8x8xf32>, vector<2x8x128xf32>, vector<2x8x128xf32> -> vector<2x8x128xf32>
    "tpu.trace_stop"() : () -> ()
    %28 = tpu.reciprocal %26 : vector<2x8x1xf32> -> vector<2x8x1xf32>
    %29 = vector.broadcast %28 : vector<2x8x1xf32> to vector<2x8x128xf32>
    %30 = arith.mulf %27, %29 : vector<2x8x128xf32>
    %c0_14 = arith.constant 0 : index
    %c0_15 = arith.constant 0 : index
    %c0_16 = arith.constant 0 : index
    %31 = vector.load %arg5[%c0_14, %c0_15, %c0_16] : memref<2x8x128xf32, #tpu.memory_space<vmem>>, vector<2x8x128xf32>
    tpu.vector_store %arg5[%c0_14, %c0_15, %c0_16], %30 {strides = array<i32>} : memref<2x8x128xf32, #tpu.memory_space<vmem>>, vector<2x8x128xf32>,
    return
  }
  func.func @transform_0(%arg0: i32) -> (i32, i32, i32) {
    %c0_i32 = arith.constant 0 : i32
    %c0_i32_0 = arith.constant 0 : i32
    %c0_i32_1 = arith.constant 0 : i32
    return %arg0, %c0_i32, %c0_i32_0 : i32, i32, i32
  }
  func.func @transform_1(%arg0: i32) -> (i32, i32, i32) {
    %c0_i32 = arith.constant 0 : i32
    %c0_i32_0 = arith.constant 0 : i32
    %c0_i32_1 = arith.constant 0 : i32
    %c0_i32_2 = arith.constant 0 : i32
    return %c0_i32, %c0_i32_0, %c0_i32_1 : i32, i32, i32
  }
  func.func @transform_2(%arg0: i32) -> (i32, i32) {
    %c0_i32 = arith.constant 0 : i32
    %c0_i32_0 = arith.constant 0 : i32
    %c0_i32_1 = arith.constant 0 : i32
    return %c0_i32, %c0_i32_0 : i32, i32
  }
  func.func @transform_3(%arg0: i32) -> (i32, i32) {
    %c0_i32 = arith.constant 0 : i32
    %c0_i32_0 = arith.constant 0 : i32
    %c0_i32_1 = arith.constant 0 : i32
    return %c0_i32, %c0_i32_0 : i32, i32
  }
  func.func @transform_4(%arg0: i32) -> (i32, i32, i32) {
    %c0_i32 = arith.constant 0 : i32
    %c0_i32_0 = arith.constant 0 : i32
    %c0_i32_1 = arith.constant 0 : i32
    return %arg0, %c0_i32, %c0_i32_0 : i32, i32, i32
  }
}

</mosaic_0001>

<bundles_post_ra>
// kernel: tpu_custom_call.1
= control target key start
LH: loop header
LB: loop body
LE: loop exit
PB: predicated region body
PF: predicated region fallthrough
CT: control target
= control target key end

     0   :  { %9 = vsyncpa [#allocation3], 0  ;;  %s565_s0 = inlined_call_operand.hbm [shape: f32[2,8,32], index: 0, kind: input, shape index: {}]   ;;  %s566_s1 = inlined_call_operand.hbm [shape: s32[1,8,8], index: 1, kind: input, shape index: {}]   ;;  %s567_s2 = inlined_call_operand.hbm [shape: f32[32,384], index: 2, kind: input, shape index: {}]   ;;  %s568_s3 = inlined_call_operand.hbm [shape: f32[1,384], index: 3, kind: input, shape index: {}]   ;;  %s569_s4 = inlined_call_operand.hbm [shape: f32[2,8,128], index: 4, kind: output, shape index: {}]  }
   0x1   :  { %10 = vsyncpa [#allocation6], 0 }
   0x2   :  { %11 = vsyncpa [#allocation9], 0  ;;  %s31_s17 = sshll.u32 %s566_s1, 4  ;;  %s32_s17 = int_to_ptr.hbm [resolvable:$true] %s31_s17 }
   0x3   :  { %12 = vsyncpa [#allocation4], 0  ;;  %s498_s18 = smov [#allocation5]   ;;  %s17_s22 = sshll.u32 %s565_s0, 4  ;;  %s18_s22 = int_to_ptr.hbm [resolvable:$true] %s17_s22 }
   0x4   :  { %s33_s19 = sshll.u32 %s498_s18, 4  ;;  %s499_s23 = smov [#allocation2]   ;;  %s34_s19 = int_to_ptr.vmem [resolvable:$true] %s33_s19 }
   0x5   :  { %36 = dma.hbm_to_vmem [thread:$0]  %s32_s17, 128, %s34_s19, [#allocation6]  }
   0x6   :  { %s19_s24 = sshll.u32 %s499_s23, 4  ;;  %s500_s25 = smov 128   ;;  %s20_s24 = int_to_ptr.vmem [resolvable:$true] %s19_s24 }
   0x7   :  { %s501_s26 = smov 8   ;;  %s41_s28 = sshll.u32 %s567_s2, 4  ;;  %s42_s28 = int_to_ptr.hbm [resolvable:$true] %s41_s28 }
   0x8   :  { %25 = dma.hbm_to_vmem [thread:$0]  %s18_s22, 256, %s20_s24, [#allocation3], %s500_s25, %s500_s25, %s501_s26  }
   0x9   :  { %s502_s29 = smov [#allocation7]   ;;  %s55_s6 = sshll.u32 %s568_s3, 4  ;;  %s56_s6 = int_to_ptr.hbm [resolvable:$true] %s55_s6 }
   0xa   :  { %s43_s30 = sshll.u32 %s502_s29, 4  ;;  %s503_s7 = smov 384   ;;  %s44_s30 = int_to_ptr.vmem [resolvable:$true] %s43_s30 }
   0xb   :  { %s504_s8 = smov 24   ;;  %s505_s9 = smov [#allocation8]  }
   0xc   :  { %49 = dma.hbm_to_vmem [thread:$0]  %s42_s28, 1536, %s44_s30, [#allocation6], %s503_s7, %s503_s7, %s504_s8  }
   0xd   :  { %s57_s10 = sshll.u32 %s505_s9, 4  ;;  %s58_s10 = int_to_ptr.vmem [resolvable:$true] %s57_s10 }
   0xe   :  { %60 = dma.hbm_to_vmem [thread:$0]  %s56_s6, 48, %s58_s10, [#allocation9]  }
   0xf   :  { %490 = dma.done.wait [#allocation3], 256  }
  0x10   :  { %491 = vsyncadd [#allocation3], 4294967040 }
  0x11   :  { %492 = dma.done.wait [#allocation6], 1664  }
  0x12   :  { %493 = vsyncadd [#allocation6], 4294965632 }
  0x13   :  { %494 = dma.done.wait [#allocation9], 48  }
  0x14   :  { %495 = vsyncadd [#allocation9], 4294967248  ;;  %v90_v0 = vld [vmem:[#allocation7 + $0x50] sm:$0xff]  ;;  %v87_v1 = vld [vmem:[#allocation7 + $0x38] sm:$0xff]  ;;  %vm93_vm0 = vcmask 261120   ;;  %vm227_vm2 = vcmask 64512  }
  0x15   :  { %v89_v2 = vld [vmem:[#allocation7 + $0x48] sm:$0xff]  ;;  %135 = vmatpush.msra.mxu1 %v90_v0  ;;  %v86_v3 = vld [vmem:[#allocation7 + $0x30] sm:$0xff]  ;;  %v84_v4 = vld [vmem:[#allocation7 + $0x20] sm:$0xff]  ;;  %s506_s2 = smov [#allocation10]   ;;  %s330_s13 = sshll.u32 %s569_s4, 4  ;;  %s331_s13 = int_to_ptr.hbm [resolvable:$true] %s330_s13 }
  0x16   :  { %112 = vmatpush.msra.mxu0 %v89_v2  ;;  %v83_v5 = vld [vmem:[#allocation7 + $0x18] sm:$0xff]  ;;  %v81_v6 = vld [vmem:[#allocation7 + $0x8] sm:$0xff]  ;;  %v80_v7 = vld [vmem:[#allocation7] sm:$0xff]  ;;  %s328_s3 = sshll.u32 %s506_s2, 4  ;;  %s329_s3 = int_to_ptr.vmem [resolvable:$true] %s328_s3 }
  0x17   :  { %136 = vmatpush.msra.mxu1 %v87_v1  ;;  %v77_v8 = vld [vmem:[#allocation2] sm:$0xff]  ;;  %v78_v9 = vld [vmem:[#allocation2 + $0x8] sm:$0xff]  ;;  %v91_v10 = vld [vmem:[#allocation7 + $0x58] sm:$0xff] }
  0x18   :  { %113 = vmatpush.msra.mxu0 %v86_v3  ;;  %v88_v11 = vld [vmem:[#allocation7 + $0x40] sm:$0xff]  ;;  %158 = vmatpush.msra.mxu2 %v91_v10  ;;  %v85_v12 = vld [vmem:[#allocation7 + $0x28] sm:$0xff]  ;;  %v82_v13 = vld [vmem:[#allocation7 + $0x10] sm:$0xff] }
  0x19   :  { %137 = vmatpush.msra.mxu1 %v84_v4  ;;  %v92_v14 = vld [vmem:[#allocation8] sm:$0x7]  ;;  %v79_v25 = vld [vmem:[#allocation5] sm:$0xff] }
  0x1a   :  { %114 = vmatpush.msra.mxu0 %v83_v5  ;;  %159 = vmatpush.msra.mxu2 %v88_v11  ;;  %v171_v15 = vperm.slane %v92_v14, 1  ;;  %v170_v16 = vperm.slane %v92_v14, 0  ;;  %vm222_vm1 = vcmp.eq.s32.totalorder %v79_v25, 0  ;;  %v172_v33 = vperm.slane %v92_v14, 2 }
  0x1b   :  { %138 = vmatpush.msra.mxu1 %v81_v6 }
  0x1c   :  { %115 = vmatpush.msra.mxu0 %v80_v7  ;;  %347 = vmatmul.msk.f32.vlgmr.msra.gmra.mxu1 %vm93_vm0, %v77_v8 }
  0x1d   :  { %345 = vmatmul.msk.f32.vlgmr.msra.gmra.mxu0 %vm93_vm0, %v77_v8  ;;  %160 = vmatpush.msra.mxu2 %v85_v12 }
  0x1f   :  { %161 = vmatpush.msra.mxu2 %v82_v13 }
  0x20   :  { %349 = vmatmul.msk.f32.vlgmr.msra.gmra.mxu2 %vm93_vm0, %v77_v8 }
  0x24   :  { %348 = vmatmul.msk.f32.gmra.mxu1 %vm93_vm0, %v78_v9 }
  0x25   :  { %346 = vmatmul.msk.f32.gmra.mxu0 %vm93_vm0, %v78_v9 }
  0x28   :  { %350 = vmatmul.msk.f32.gmra.mxu2 %vm93_vm0, %v78_v9 }
  0x99   :  { %v140_v17 = vpop.f32.mrf.mxu1 }
  0x9a   :  { %v117_v18 = vpop.f32.mrf.mxu0  ;;  %v177_v19 = vadd.f32 %v171_v15, %v140_v17 }
  0x9b   :  { %v176_v20 = vadd.f32 %v170_v16, %v117_v18 }
  0x9c   :  { %197 = vmatpush.xpose.msra.mxu3 %v177_v19 }
  0x9f   :  { %198 = vmatmul.f32.vlgmr.msra.gmra.mxu3 %v176_v20 }
  0xa1   :  { %v143_v21 = vpop.f32.mrf.mxu1 }
  0xa2   :  { %v120_v22 = vpop.f32.mrf.mxu0  ;;  %v180_v23 = vadd.f32 %v171_v15, %v143_v21 }
  0xa3   :  { %v179_v24 = vadd.f32 %v170_v16, %v120_v22  ;;  %v163_v32 = vpop.f32.mrf.mxu2 }
  0xa4   :  { %217 = vmatpush.xpose.msrb.mxu3 %v180_v23  ;;  %v178_v34 = vadd.f32 %v172_v33, %v163_v32 }
  0xa7   :  { %218 = vmatmul.f32.vlgmr.msrb.gmra.mxu3 %v179_v24 }
  0xa8   :  { %264 = vmatpush.msra.mxu3 %v178_v34 }
  0xab   :  { %v166_v35 = vpop.f32.mrf.mxu2 }
  0xac   :  { %v181_v36 = vadd.f32 %v172_v33, %v166_v35 }
  0xae   :  { %287 = vmatpush.msrb.mxu0 %v181_v36 }
 0x122   :  { %v199_v26 = vpop.f32.mrf.mxu3 }
 0x123   :  { %v225_v27 = vsel %vm222_vm1, -1e+09, %v199_v26 }
 0x124   :  { %v228_v28 = vsel %vm227_vm2, %v225_v27, -inf }
 0x125   :  { %229 = vmax.xlane.f32.xlu0 %v228_v28 }
 0x12a   :  { %v219_v29 = vpop.f32.mrf.mxu3 }
 0x12b   :  { %v226_v30 = vsel %vm222_vm1, -1e+09, %v219_v29 }
 0x12c   :  { %v231_v31 = vsel %vm227_vm2, %v226_v30, -inf }
 0x12d   :  { %232 = vmax.xlane.f32.xlu0 %v231_v31 }
 0x198   :  { %v230_v37 = vpop.xlane.xlu0 %229 }
 0x199   :  { %v234_v38 = vsub.f32 %v225_v27, %v230_v37 }
 0x19b   :  { %v236_v39 = vmul.f32 1.442695, %v234_v38 }
 0x19d   :  { %362 = vpow2.f32 %v236_v39 }
 0x1a0   :  { %v233_v40 = vpop.xlane.xlu0 %232 }
 0x1a1   :  { %v235_v41 = vsub.f32 %v226_v30, %v233_v40 }
 0x1a3   :  { %v363_v42 = vpop.eup %362  ;;  %v238_v43 = vmul.f32 1.442695, %v235_v41 }
 0x1a4   :  { %351 = vmatmul.msk.f32.vlgmr.msra.gmra.mxu3 %vm227_vm2, %v363_v42  ;;  %v240_v44 = vsel %vm227_vm2, %v363_v42, 0.0 }
 0x1a5   :  { %364 = vpow2.f32 %v238_v43  ;;  %241 = vadd.xlane.f32.xlu1 %v240_v44 }
 0x1ab   :  { %v365_v45 = vpop.eup %364 }
 0x1ac   :  { %352 = vmatmul.msk.f32.vlgmr.msrb.gmra.mxu0 %vm227_vm2, %v365_v45  ;;  %v243_v46 = vsel %vm227_vm2, %v365_v45, 0.0 }
 0x1ad   :  { %244 = vadd.xlane.f32.xlu1 %v243_v46 }
 0x218   :  { %v242_v47 = vpop.xlane.xlu1 %241 }
 0x219   :  { %366 = vrcp.f32 %v242_v47  ;;  %v303_v52 = vand.u32 2147483648, %v242_v47  ;;  %v301_v54 = vand.u32 2147483647, %v242_v47  ;;  %vm297_vm4 = vweird.f32 %v242_v47 }
 0x21b   :  { %v304_v57 = vor.u32 1.1754944e-38, %v303_v52  ;;  %vm302_vm6 = vcmp.eq.f32.partialorder %v301_v54, 8.507059e+37 }
 0x21f   :  { %v367_v48 = vpop.eup %366 }
 0x220   :  { %v293_v49 = vmul.f32 %v367_v48, %v242_v47  ;;  %v245_v50 = vpop.xlane.xlu1 %244  ;;  %vm298_vm3 = vweird.f32 %v367_v48 }
 0x221   :  { %368 = vrcp.f32 %v245_v50  ;;  %vm299_vm5 = vmor %vm297_vm4, %vm298_vm3  ;;  %v317_v0 = vand.u32 2147483648, %v245_v50  ;;  %v315_v2 = vand.u32 2147483647, %v245_v50  ;;  %vm311_vm8 = vweird.f32 %v245_v50 }
 0x222   :  { %v294_v51 = vsub.f32 1.0, %v293_v49 }
 0x223   :  { %v318_v4 = vor.u32 1.1754944e-38, %v317_v0  ;;  %vm316_vm10 = vcmp.eq.f32.partialorder %v315_v2, 8.507059e+37 }
 0x224   :  { %v295_v53 = vmul.f32 %v367_v48, %v294_v51 }
 0x226   :  { %v296_v55 = vadd.f32 %v367_v48, %v295_v53 }
 0x227   :  { %v369_v56 = vpop.eup %368  ;;  %v266_v60 = vpop.f32.mrf.mxu3 }
 0x228   :  { %v307_v58 = vmul.f32 %v369_v56, %v245_v50  ;;  %v300_v59 = vsel %vm299_vm5, %v367_v48, %v296_v55  ;;  %vm312_vm7 = vweird.f32 %v369_v56 }
 0x229   :  { %v305_v61 = vsel %vm302_vm6, %v304_v57, %v300_v59  ;;  %vm313_vm9 = vmor %vm311_vm8, %vm312_vm7  ;;  %v289_v6 = vpop.f32.mrf.mxu0 }
 0x22a   :  { %v308_v62 = vsub.f32 1.0, %v307_v58  ;;  %v320_v63 = vmul.f32 %v305_v61, %v266_v60 }
 0x22c   :  { %v309_v1 = vmul.f32 %v369_v56, %v308_v62  ;;  %322 = vst [vmem:[#allocation10] sm:$0xff] %v320_v63 }
 0x22e   :  { %v310_v3 = vadd.f32 %v369_v56, %v309_v1 }
 0x230   :  { %v314_v5 = vsel %vm313_vm9, %v369_v56, %v310_v3 }
 0x231   :  { %v319_v7 = vsel %vm316_vm10, %v318_v4, %v314_v5 }
 0x232   :  { %v321_v8 = vmul.f32 %v319_v7, %v289_v6 }
 0x234   :  { %323 = vst [vmem:[#allocation10 + $0x8] sm:$0xff] %v321_v8 }
 0x235   :  { %336 = dma.vmem_to_hbm [thread:$0]  %s329_s3, 256, %s331_s13, [#allocation4], %s500_s25, %s500_s25, %s501_s26  }
 0x236   :  { %496 = dma.done.wait [#allocation4], 256  }
 0x237   :  { %497 = vsyncadd [#allocation4], 4294967040 }
 0x238   :  { %341 = vsyncpa [#allocation3], 1 }
 0x239   :  { %342 = vsyncpa [#allocation6], 1 }
 0x23a   :  { %343 = vsyncpa [#allocation9], 1 }
 0x23b   :  { %344 = vsyncpa [#allocation4], 1 }

</bundles_post_ra>
